<compile_context>
chip_gen: v6e
topology: v6e:2x2x1
jax: 0.10.0
libtpu: 0.0.40
codegen_flags: <defaults>
</compile_context>

<pallas_src>
import jax
import jax.numpy as jnp
from jax.experimental import pallas as pl
from jax.experimental.pallas import tpu as pltpu


def _round_up(x: int, m: int) -> int:
    return (x + m - 1) // m * m


def _make_kernel(bb: int, n_pad: int, n_real: int, ct: int, d: int):
    def kernel(x_ref, w_ref, out_ref):
        # x_ref: [bb, n_pad, ct] bf16 ; w_ref: [ct, 2d] bf16 ; out_ref: [bb, n_pad, n_pad] f32
        x2d = x_ref[...].reshape(bb * n_pad, ct)           # leading-dim merge: layout-free
        # Fused projections in one MXU matmul: columns [:d] = conv1, [d:] = conv2.
        f = jnp.dot(x2d, w_ref[...], preferred_element_type=jnp.float32)   # [bb*n_pad, 2d]
        f = f.reshape(bb, n_pad, 2 * d)                    # leading-dim split: layout-free
        f1 = f[:, :, :d]
        f2 = f[:, :, d:]
        # Attention logits: batched over bb, contracting d (no transpose materialized).
        logits = jnp.einsum("bnd,bmd->bnm", f1, f2,
                            preferred_element_type=jnp.float32)            # [bb, n_pad, n_pad]
        if n_pad != n_real:
            # Padded key columns must not contribute to the softmax denominator.
            col = jax.lax.broadcasted_iota(jnp.int32, logits.shape, 2)
            logits = jnp.where(col < n_real, logits, -jnp.inf)
        # Numerically-stable row softmax (f32); divide via EUP approximate reciprocal.
        m = jnp.max(logits, axis=-1, keepdims=True)
        e = jnp.exp(logits - m)
        s = jnp.sum(e, axis=-1, keepdims=True)
        out_ref[...] = e * pl.reciprocal(s, approx=True)

    return kernel


def _pick_batch_block(B: int, per_batch_block_bytes: int, max_bb: int = 8,
                      vmem_budget_bytes: int = 16 * 1024 * 1024) -> int:
    """Largest divisor of B that (a) keeps the double-buffered blocks inside the VMEM
    budget and (b) leaves >= 2 grid steps whenever B >= 2 (so both v7x TCs get work)."""
    best = 1
    for cand in range(min(max_bb, B), 0, -1):
        if B % cand != 0:
            continue
        if B >= 2 and B // cand < 2:
            continue
        if 2 * cand * per_batch_block_bytes > vmem_budget_bytes:
            continue
        best = cand
        break
    return best


def satt_h_gcn(seq, a, w1, w2):
    """seq: [B, c_in, N, T]; a: unused (kept for parity with the PyTorch forward);
    w1, w2: Conv2d weights [c_in//8, c_in, 1, T] (bias=False). Returns [B, N, N] f32.
    Note: assumes B > 1 (PyTorch's .squeeze() would also drop a unit batch dim)."""
    del a
    B, c_in, N, T = seq.shape
    d = w1.shape[0]
    assert w1.shape == (d, c_in, 1, T) and w2.shape == (d, c_in, 1, T)
    CT = c_in * T
    n_pad = _round_up(N, 8)

    # Lane-dense activations, fused with the bf16 cast: x[b, n, c*T + t] = seq[b, c, n, t].
    x = jnp.transpose(seq, (0, 2, 1, 3)).reshape(B, N, CT)
    if n_pad != N:
        x = jnp.pad(x, ((0, 0), (0, n_pad - N), (0, 0)))
    x = x.astype(jnp.bfloat16)

    # Packed weights [CT, 2d]: W[c*T + t, o] = w1[o, c, 0, t] (cols :d) / w2 (cols d:).
    w1m = jnp.transpose(w1[:, :, 0, :].reshape(d, CT))
    w2m = jnp.transpose(w2[:, :, 0, :].reshape(d, CT))
    w_packed = jnp.concatenate([w1m, w2m], axis=1).astype(jnp.bfloat16)    # [CT, 2d]

    per_batch_bytes = n_pad * CT * 2 + n_pad * n_pad * 4   # bf16 x block + f32 out block
    bb = _pick_batch_block(B, per_batch_bytes)
    grid = (B // bb,)

    kernel = _make_kernel(bb, n_pad, N, CT, d)
    out = pl.pallas_call(
        kernel,
        out_shape=jax.ShapeDtypeStruct((B, n_pad, n_pad), jnp.float32),
        grid=grid,
        in_specs=[
            pl.BlockSpec((bb, n_pad, CT), lambda i: (i, 0, 0)),    # x: bb batch elems / step
            pl.BlockSpec((CT, 2 * d), lambda i: (0, 0)),           # packed weights (VMEM-resident)
        ],
        out_specs=pl.BlockSpec((bb, n_pad, n_pad), lambda i: (i, 0, 0)),
        compiler_params=pltpu.CompilerParams(
            dimension_semantics=("parallel",),                     # batch blocks are independent
            vmem_limit_bytes=32 * 1024 * 1024,
        ),
    )(x, w_packed)

    if n_pad != N:
        out = out[:, :N, :N]
    return out


def reference(seq, a, w1, w2):
    """Pure-JAX replica of the PyTorch forward (f32, HIGHEST matmul precision)."""
    del a
    p = jax.lax.Precision.HIGHEST
    f1 = jnp.einsum("bcnt,oct->bno", seq, w1[:, :, 0, :], precision=p)
    f2 = jnp.einsum("bcnt,oct->bon", seq, w2[:, :, 0, :], precision=p)
    logits = jnp.einsum("bno,bom->bnm", f1, f2, precision=p)
    return jax.nn.softmax(logits, axis=-1)


def reference_bf16(seq, a, w1, w2):
    """Same math at the kernel's operand precision (bf16 MXU inputs, f32 accumulation)."""
    del a
    B, c_in, N, T = seq.shape
    d = w1.shape[0]
    x = jnp.transpose(seq, (0, 2, 1, 3)).reshape(B, N, c_in * T).astype(jnp.bfloat16)
    W1 = jnp.transpose(w1[:, :, 0, :].reshape(d, c_in * T)).astype(jnp.bfloat16)
    W2 = jnp.transpose(w2[:, :, 0, :].reshape(d, c_in * T)).astype(jnp.bfloat16)
    f1 = jnp.dot(x, W1, preferred_element_type=jnp.float32)
    f2 = jnp.dot(x, W2, preferred_element_type=jnp.float32)
    logits = jnp.einsum("bnd,bmd->bnm", f1, f2, preferred_element_type=jnp.float32)
    return jax.nn.softmax(logits, axis=-1)


if __name__ == "__main__":
    # c_in must be divisible by 8; B > 1 so torch's .squeeze() only drops the temporal dim.
    B, c_in, N, T = 2, 32, 16, 16
    d = c_in // 8

    key = jax.random.PRNGKey(0)
    ks, ka, k1, k2 = jax.random.split(key, 4)
    seq = jax.random.normal(ks, (B, c_in, N, T), dtype=jnp.float32)
    a = jax.random.normal(ka, (B, N, N), dtype=jnp.float32)              # unused by the forward
    w1 = jax.random.normal(k1, (d, c_in, 1, T), dtype=jnp.float32) * 0.05
    w2 = jax.random.normal(k2, (d, c_in, 1, T), dtype=jnp.float32) * 0.05

    out = jax.jit(satt_h_gcn)(seq, a, w1, w2)
    out = jax.block_until_ready(out)
    assert out.shape == (B, N, N)

    # Tight check vs a precision-matched reference (validates the kernel itself; tolerance
    # also covers the EUP approximate reciprocal used in the softmax normalization).
    ref_matched = reference_bf16(seq, a, w1, w2)
    if not jnp.allclose(out, ref_matched, rtol=5e-2, atol=5e-3):
        raise AssertionError("Pallas kernel mismatch vs precision-matched (bf16) reference")

    # Loose check vs the full-f32 PyTorch-semantics replica (bf16 MXU operands shift the
    # logits slightly; softmax outputs lie in [0, 1] so these bounds still catch real bugs).
    ref_f32 = reference(seq, a, w1, w2)
    if not jnp.allclose(out, ref_f32, rtol=1e-1, atol=5e-2):
        raise AssertionError("Pallas kernel mismatch vs f32 reference")

    print("KERNEL_OK")
</pallas_src>

<mosaic_0001>
module attributes {stable_mosaic.version = 11 : i64} {
  func.func @kernel(%arg0: i32, %arg1: memref<1x16x512xbf16, #tpu.memory_space<vmem>>, %arg2: memref<512x8xbf16, #tpu.memory_space<vmem>>, %arg3: memref<1x16x16xf32, #tpu.memory_space<vmem>>) attributes {dimension_semantics = [#tpu.dimension_semantics<parallel>], iteration_bounds = array<i64: 2>, scalar_prefetch = 0 : i64, scratch_operands = 0 : i64, tpu.core_type = #tpu.core_type<tc>, window_params = [{transform_indices = @transform_0, window_bounds = array<i64: 1, 16, 512>}, {pipeline_mode = #tpu.pipeline_mode<synchronous>, transform_indices = @transform_1, window_bounds = array<i64: 512, 8>}, {transform_indices = @transform_2, window_bounds = array<i64: 1, 16, 16>}]} {
    %c0 = arith.constant 0 : index
    %c0_0 = arith.constant 0 : index
    %c0_1 = arith.constant 0 : index
    %0 = vector.load %arg1[%c0, %c0_0, %c0_1] : memref<1x16x512xbf16, #tpu.memory_space<vmem>>, vector<1x16x512xbf16>
    %1 = vector.shape_cast %0 : vector<1x16x512xbf16> to vector<16x512xbf16>
    %c0_2 = arith.constant 0 : index
    %c0_3 = arith.constant 0 : index
    %2 = vector.load %arg2[%c0_2, %c0_3] : memref<512x8xbf16, #tpu.memory_space<vmem>>, vector<512x8xbf16>
    %cst = arith.constant dense<0.000000e+00> : vector<16x8xf32>
    %3 = tpu.matmul %1, %2, %cst {dimension_numbers = #tpu.dot_dimension_numbers<[1], [0], [0], [1], [0, 0, 1, 1], [], []>} : vector<16x512xbf16>, vector<512x8xbf16>, vector<16x8xf32> -> vector<16x8xf32>
    %4 = vector.shape_cast %3 : vector<16x8xf32> to vector<1x16x8xf32>
    %5 = vector.extract_strided_slice %4 {offsets = [0, 0, 0], sizes = [1, 16, 4], strides = [1, 1, 1]} : vector<1x16x8xf32> to vector<1x16x4xf32>
    %6 = vector.extract_strided_slice %4 {offsets = [0, 0, 4], sizes = [1, 16, 4], strides = [1, 1, 1]} : vector<1x16x8xf32> to vector<1x16x4xf32>
    "tpu.trace_start"() <{level = 10 : i32, message = "bnd,bmd->bnm"}> : () -> ()
    %cst_4 = arith.constant dense<0.000000e+00> : vector<1x16x16xf32>
    %7 = tpu.matmul %5, %6, %cst_4 {dimension_numbers = #tpu.dot_dimension_numbers<[2], [2], [1], [1], [0, 0, 0, 1, 1, 1], [0], [0]>} : vector<1x16x4xf32>, vector<1x16x4xf32>, vector<1x16x16xf32> -> vector<1x16x16xf32>
    "tpu.trace_stop"() : () -> ()
    %cst_5 = arith.constant dense<0xFF800000> : vector<1x16xf32>
    %8 = vector.multi_reduction <maximumf>, %7, %cst_5 [2] : vector<1x16x16xf32> to vector<1x16xf32>
    %9 = vector.shape_cast %8 : vector<1x16xf32> to vector<1x16x1xf32>
    %10 = vector.broadcast %9 : vector<1x16x1xf32> to vector<1x16x16xf32>
    %11 = arith.subf %7, %10 : vector<1x16x16xf32>
    %12 = math.exp %11 : vector<1x16x16xf32>
    %cst_6 = arith.constant dense<0.000000e+00> : vector<1x16xf32>
    %13 = vector.multi_reduction <add>, %12, %cst_6 [2] : vector<1x16x16xf32> to vector<1x16xf32>
    %14 = vector.shape_cast %13 : vector<1x16xf32> to vector<1x16x1xf32>
    %15 = tpu.reciprocal %14 {approx = true} : vector<1x16x1xf32> -> vector<1x16x1xf32>
    %16 = vector.broadcast %15 : vector<1x16x1xf32> to vector<1x16x16xf32>
    %17 = arith.mulf %12, %16 : vector<1x16x16xf32>
    %c0_7 = arith.constant 0 : index
    %c0_8 = arith.constant 0 : index
    %c0_9 = arith.constant 0 : index
    %18 = vector.load %arg3[%c0_7, %c0_8, %c0_9] : memref<1x16x16xf32, #tpu.memory_space<vmem>>, vector<1x16x16xf32>
    tpu.vector_store %arg3[%c0_7, %c0_8, %c0_9], %17 {strides = array<i32>} : memref<1x16x16xf32, #tpu.memory_space<vmem>>, vector<1x16x16xf32>,
    return
  }
  func.func @transform_0(%arg0: i32) -> (i32, i32, i32) {
    %c0_i32 = arith.constant 0 : i32
    %c0_i32_0 = arith.constant 0 : i32
    %c0_i32_1 = arith.constant 0 : i32
    return %arg0, %c0_i32, %c0_i32_0 : i32, i32, i32
  }
  func.func @transform_1(%arg0: i32) -> (i32, i32) {
    %c0_i32 = arith.constant 0 : i32
    %c0_i32_0 = arith.constant 0 : i32
    %c0_i32_1 = arith.constant 0 : i32
    return %c0_i32, %c0_i32_0 : i32, i32
  }
  func.func @transform_2(%arg0: i32) -> (i32, i32, i32) {
    %c0_i32 = arith.constant 0 : i32
    %c0_i32_0 = arith.constant 0 : i32
    %c0_i32_1 = arith.constant 0 : i32
    return %arg0, %c0_i32, %c0_i32_0 : i32, i32, i32
  }
}

</mosaic_0001>

<bundles_post_ra>
// kernel: squeeze.1
= control target key start
LH: loop header
LB: loop body
LE: loop exit
PB: predicated region body
PF: predicated region fallthrough
CT: control target
= control target key end

     0   :  { %s896_s18 = smov 24  ;;  %s906_s23 = smov 24  ;;  %vm281_vm0 = vcmask 1041409   ;;  %vm285_vm1 = vcmask 1042434   ;;  %vm290_vm2 = vcmask 1044483   ;;  %vm294_vm3 = vcmask 1045509   ;;  %s1042_s0 = inlined_call_operand.vmem [shape: bf16[4,32,1,16], index: 0, kind: input, shape index: {}]   ;;  %s1043_s1 = inlined_call_operand.vmem [shape: bf16[4,512], index: 1, kind: output, shape index: {}]  }
   0x1   :  { %v846_v0 = vld [vmem:[%s1042_s0 + $0x30] sm:$0xff]   ;;  %v848_v1 = vld [vmem:[%s1042_s0 + $0x20] sm:$0xff]   ;;  %v845_v8 = vld [vmem:[%s1042_s0 + $0x38] sm:$0xff]   ;;  %s908_s24 = smov 24  ;;  %s910_s25 = smov 24  ;;  %vm298_vm4 = vcmask 1046534  }
   0x2   :  { %v850_v2 = vld [vmem:[%s1042_s0 + $0x10] sm:$0xff]   ;;  %v819_v3 = vunpack.c.l.bf16 %v846_v0  ;;  %v820_v4 = vunpack.c.h.bf16 %v846_v0  ;;  %v827_v5 = vunpack.c.l.bf16 %v848_v1  ;;  %v828_v6 = vunpack.c.h.bf16 %v848_v1  ;;  %v842_v7 = vld [vmem:[%s1042_s0] sm:$0xff]   ;;  %v847_v9 = vld [vmem:[%s1042_s0 + $0x28] sm:$0xff]   ;;  %s912_s26 = smov 24  ;;  %s914_s27 = smov 24 }
   0x3   :  { %v835_v10 = vunpack.c.l.bf16 %v850_v2  ;;  %v836_v11 = vunpack.c.h.bf16 %v850_v2  ;;  %v843_v12 = vunpack.c.l.bf16 %v842_v7  ;;  %v844_v13 = vunpack.c.h.bf16 %v842_v7  ;;  %v849_v14 = vld [vmem:[%s1042_s0 + $0x18] sm:$0xff]   ;;  %v851_v15 = vld [vmem:[%s1042_s0 + $0x8] sm:$0xff]   ;;  %s904_s0 = smov 24  ;;  %s916_s28 = smov 24 }
   0x4   :  { %53 = vst [vmem:[#allocation1 + $0x68] sm:$0xff] %v820_v4  ;;  %69 = vst [vmem:[#allocation1 + $0x60] sm:$0xff] %v819_v3  ;;  %v815_v16 = vunpack.c.l.bf16 %v845_v8  ;;  %v816_v17 = vunpack.c.h.bf16 %v845_v8  ;;  %v823_v18 = vunpack.c.l.bf16 %v847_v9  ;;  %v824_v19 = vunpack.c.h.bf16 %v847_v9  ;;  %s918_s29 = smov 24  ;;  %s920_s30 = smov 24 }
   0x5   :  { %117 = vst [vmem:[#allocation1 + $0x48] sm:$0xff] %v828_v6  ;;  %133 = vst [vmem:[#allocation1 + $0x40] sm:$0xff] %v827_v5  ;;  %v831_v20 = vunpack.c.l.bf16 %v849_v14  ;;  %v832_v21 = vunpack.c.h.bf16 %v849_v14  ;;  %v839_v22 = vunpack.c.l.bf16 %v851_v15  ;;  %v840_v23 = vunpack.c.h.bf16 %v851_v15  ;;  %s922_s2 = smov 24  ;;  %s924_s3 = smov 24 }
   0x6   :  { %181 = vst [vmem:[#allocation1 + $0x28] sm:$0xff] %v836_v11  ;;  %197 = vst [vmem:[#allocation1 + $0x20] sm:$0xff] %v835_v10  ;;  %vm302_vm5 = vcmask 1047559   ;;  %s860_s4 = smov 96   ;;  %s861_s5 = smov 112   ;;  %vm260_vm6 = vcmask 1047556  }
   0x7   :  { %244 = vst [vmem:[#allocation1 + $0x8] sm:$0xff] %v844_v13  ;;  %257 = vst [vmem:[#allocation1] sm:$0xff] %v843_v12  ;;  %s862_s6 = smov 80   ;;  %s863_s7 = smov 64   ;;  %vm262_vm7 = vcmask 130048   ;;  %vm306_vm8 = vcmask 1048448  }
   0x8   :  { %37 = vst [vmem:[#allocation1 + $0x70] sm:$0xff] %v815_v16  ;;  %21 = vst [vmem:[#allocation1 + $0x78] sm:$0xff] %v816_v17  ;;  %s864_s8 = smov 48   ;;  %s723_s9 = smov 24  ;;  %vm373_vm9 = vcmask 917248   ;;  %vm440_vm10 = vcmask 786048  }
   0x9   :  { %85 = vst [vmem:[#allocation1 + $0x58] sm:$0xff] %v824_v19  ;;  %101 = vst [vmem:[#allocation1 + $0x50] sm:$0xff] %v823_v18  ;;  %s865_s10 = smov 32   ;;  %s690_s11 = smov 24  ;;  %vm507_vm11 = vcmask 654848   ;;  %vm574_vm12 = vcmask 523648  }
   0xa   :  { %165 = vst [vmem:[#allocation1 + $0x30] sm:$0xff] %v831_v20  ;;  %149 = vst [vmem:[#allocation1 + $0x38] sm:$0xff] %v832_v21  ;;  %s866_s12 = smov 16   ;;  %vm641_vm13 = vcmask 392448   ;;  %vm708_vm14 = vcmask 261248  }
   0xb   :  { %213 = vst [vmem:[#allocation1 + $0x18] sm:$0xff] %v840_v23  ;;  %229 = vst [vmem:[#allocation1 + $0x10] sm:$0xff] %v839_v22  ;;  %v368_v31 = vld [vmem:[#allocation1 + $0x67] sm:$0x80]   ;;  %v301_v42 = vld [vmem:[#allocation1 + $0x68] sm:$0x80]  }
   0xc   :  { %v351_v24 = vld [vmem:[#allocation1 + $0x44] sm:$0x4]   ;;  %v364_v28 = vld [vmem:[#allocation1 + $0x48] sm:$0x40]   ;;  %v284_v36 = vld [vmem:[#allocation1 + $0x45] sm:$0x4]  }
   0xd   :  { %v347_v26 = vld [vmem:[#allocation1 + $0x25] sm:$0x2]   ;;  %v360_v30 = vld [vmem:[#allocation1 + $0x29] sm:$0x20]   ;;  %v280_v33 = vld [vmem:[#allocation1 + $0x26] sm:$0x2]  }
   0xe   :  { %v345_v25 = vld [vmem:[#allocation1 + $0x6] sm:$0x1]   ;;  %v278_v32 = vld [vmem:[#allocation1 + $0x7] sm:$0x1]   ;;  %v293_v38 = vld [vmem:[#allocation1 + $0x2a] sm:$0x20]  }
   0xf   :  { %v356_v27 = vld [vmem:[#allocation1 + $0x16e] ss:$-88 sm:%s896_s18]   ;;  %v349_v29 = vsel %vm281_vm0, %v347_v26, %v345_v25  ;;  %v282_v35 = vsel %vm281_vm0, %v280_v33, %v278_v32  ;;  %v289_v37 = vld [vmem:[#allocation1 + $0x16f] ss:$-88 sm:%s904_s0]   ;;  %v468_v18 = vld [vmem:[#allocation1 + $0x76] sm:$0x80]  }
  0x10   :  { %v353_v34 = vsel %vm285_vm1, %v351_v24, %v349_v29  ;;  %v286_v40 = vsel %vm285_vm1, %v284_v36, %v282_v35  ;;  %v297_v41 = vld [vmem:[#allocation1 + $0x49] sm:$0x40]   ;;  %v384_v47 = vld [vmem:[#allocation1 + $0x54] sm:$0x4]   ;;  %v397_v53 = vld [vmem:[#allocation1 + $0x58] sm:$0x40]  }
  0x11   :  { %v358_v39 = vsel %vm290_vm2, %v356_v27, %v353_v34  ;;  %v291_v45 = vsel %vm290_vm2, %v289_v37, %v286_v40  ;;  %v380_v46 = vld [vmem:[#allocation1 + $0x35] sm:$0x2]   ;;  %v393_v52 = vld [vmem:[#allocation1 + $0x39] sm:$0x20]   ;;  %v313_v59 = vld [vmem:[#allocation1 + $0x36] sm:$0x2]  }
  0x12   :  { %v378_v43 = vld [vmem:[#allocation1 + $0x16] sm:$0x1]   ;;  %v362_v44 = vsel %vm294_vm3, %v360_v30, %v358_v39  ;;  %v295_v50 = vsel %vm294_vm3, %v293_v38, %v291_v45  ;;  %v401_v54 = vld [vmem:[#allocation1 + $0x77] sm:$0x80]   ;;  %v311_v58 = vld [vmem:[#allocation1 + $0x17] sm:$0x1]  }
  0x13   :  { %v389_v48 = vld [vmem:[#allocation1 + $0x17e] ss:$-88 sm:%s906_s23]   ;;  %v366_v49 = vsel %vm298_vm4, %v364_v28, %v362_v44  ;;  %v382_v51 = vsel %vm281_vm0, %v380_v46, %v378_v43  ;;  %v299_v56 = vsel %vm298_vm4, %v297_v41, %v295_v50  ;;  %v317_v60 = vld [vmem:[#allocation1 + $0x55] sm:$0x4]   ;;  %v315_v63 = vsel %vm281_vm0, %v313_v59, %v311_v58  ;;  %v326_v1 = vld [vmem:[#allocation1 + $0x3a] sm:$0x20]  }
  0x14   :  { %v370_v55 = vsel %vm302_vm5, %v368_v31, %v366_v49  ;;  %v386_v57 = vsel %vm285_vm1, %v384_v47, %v382_v51  ;;  %v303_v61 = vsel %vm302_vm5, %v301_v42, %v299_v56  ;;  %v322_v0 = vld [vmem:[#allocation1 + $0x17f] ss:$-88 sm:%s908_s24]   ;;  %v319_v4 = vsel %vm285_vm1, %v317_v60, %v315_v63  ;;  %v445_v6 = vld [vmem:[#allocation1 + $0x15] sm:$0x1]   ;;  %v460_v13 = vld [vmem:[#allocation1 + $0x38] sm:$0x20]  }
  0x15   :  { %371 = vrot.lane.b32.xlu1 %v370_v55, %s860_s4  ;;  %v391_v62 = vsel %vm290_vm2, %v389_v48, %v386_v57  ;;  %v330_v2 = vld [vmem:[#allocation1 + $0x59] sm:$0x40]   ;;  %304 = vrot.lane.b32.xlu0 %v303_v61, %s861_s5  ;;  %v447_v7 = vld [vmem:[#allocation1 + $0x34] sm:$0x2]   ;;  %v324_v9 = vsel %vm290_vm2, %v322_v0, %v319_v4  ;;  %v464_v17 = vld [vmem:[#allocation1 + $0x57] sm:$0x40]  }
  0x16   :  { %v395_v3 = vsel %vm294_vm3, %v393_v52, %v391_v62  ;;  %v334_v5 = vld [vmem:[#allocation1 + $0x78] sm:$0x80]   ;;  %v449_v10 = vsel %vm281_vm0, %v447_v7, %v445_v6  ;;  %v451_v11 = vld [vmem:[#allocation1 + $0x53] sm:$0x4]   ;;  %v328_v15 = vsel %vm294_vm3, %v326_v1, %v324_v9  ;;  %v412_v19 = vld [vmem:[#allocation1 + $0x5] sm:$0x1]  }
  0x17   :  { %v399_v8 = vsel %vm298_vm4, %v397_v53, %v395_v3  ;;  %v456_v12 = vld [vmem:[#allocation1 + $0x17d] ss:$-88 sm:%s910_s25]   ;;  %v453_v16 = vsel %vm285_vm1, %v451_v11, %v449_v10  ;;  %v332_v20 = vsel %vm298_vm4, %v330_v2, %v328_v15  ;;  %v512_v33 = vld [vmem:[#allocation1 + $0x14] sm:$0x1]   ;;  %v527_v40 = vld [vmem:[#allocation1 + $0x37] sm:$0x20]  }
  0x18   :  { %v403_v14 = vsel %vm302_vm5, %v401_v54, %v399_v8  ;;  %v458_v21 = vsel %vm290_vm2, %v456_v12, %v453_v16  ;;  %v414_v22 = vld [vmem:[#allocation1 + $0x24] sm:$0x2]   ;;  %v336_v25 = vsel %vm302_vm5, %v334_v5, %v332_v20  ;;  %v427_v28 = vld [vmem:[#allocation1 + $0x28] sm:$0x20]   ;;  %v514_v34 = vld [vmem:[#allocation1 + $0x33] sm:$0x2]  }
  0x19   :  { %404 = vrot.lane.b32.xlu1 %v403_v14, %s860_s4  ;;  %v418_v23 = vld [vmem:[#allocation1 + $0x43] sm:$0x4]   ;;  %v462_v26 = vsel %vm294_vm3, %v460_v13, %v458_v21  ;;  %v416_v27 = vsel %vm281_vm0, %v414_v22, %v412_v19  ;;  %v431_v29 = vld [vmem:[#allocation1 + $0x47] sm:$0x40]   ;;  %337 = vrot.lane.b32.xlu0 %v336_v25, %s861_s5  ;;  %v518_v35 = vld [vmem:[#allocation1 + $0x52] sm:$0x4]   ;;  %v516_v38 = vsel %vm281_vm0, %v514_v34, %v512_v33 }
  0x1a   :  { %v423_v24 = vld [vmem:[#allocation1 + $0x16d] ss:$-88 sm:%s912_s26]   ;;  %v466_v31 = vsel %vm298_vm4, %v464_v17, %v462_v26  ;;  %v420_v32 = vsel %vm285_vm1, %v418_v23, %v416_v27  ;;  %v523_v39 = vld [vmem:[#allocation1 + $0x17c] ss:$-88 sm:%s914_s27]   ;;  %v520_v43 = vsel %vm285_vm1, %v518_v35, %v516_v38  ;;  %v579_v58 = vld [vmem:[#allocation1 + $0x13] sm:$0x1]  }
  0x1b   :  { %v435_v30 = vld [vmem:[#allocation1 + $0x66] sm:$0x80]   ;;  %v470_v36 = vsel %vm302_vm5, %v468_v18, %v466_v31  ;;  %v425_v37 = vsel %vm290_vm2, %v423_v24, %v420_v32  ;;  %v531_v41 = vld [vmem:[#allocation1 + $0x56] sm:$0x40]   ;;  %v479_v45 = vld [vmem:[#allocation1 + $0x4] sm:$0x1]   ;;  %v525_v48 = vsel %vm290_vm2, %v523_v39, %v520_v43 }
  0x1c   :  { %v429_v42 = vsel %vm294_vm3, %v427_v28, %v425_v37  ;;  %v535_v44 = vld [vmem:[#allocation1 + $0x75] sm:$0x80]   ;;  %v481_v46 = vld [vmem:[#allocation1 + $0x23] sm:$0x2]   ;;  %v494_v52 = vld [vmem:[#allocation1 + $0x27] sm:$0x20]   ;;  %v529_v54 = vsel %vm294_vm3, %v527_v40, %v525_v48 }
  0x1d   :  { %471 = vrot.lane.b32.xlu1 %v470_v36, %s862_s6  ;;  %v433_v47 = vsel %vm298_vm4, %v431_v29, %v429_v42  ;;  %v483_v49 = vsel %vm281_vm0, %v481_v46, %v479_v45  ;;  %v485_v50 = vld [vmem:[#allocation1 + $0x42] sm:$0x4]   ;;  %v498_v56 = vld [vmem:[#allocation1 + $0x46] sm:$0x40]   ;;  %v533_v59 = vsel %vm298_vm4, %v531_v41, %v529_v54  ;;  %v581_v61 = vld [vmem:[#allocation1 + $0x32] sm:$0x2]  }
  0x1e   :  { %v490_v51 = vld [vmem:[#allocation1 + $0x16c] ss:$-88 sm:%s916_s28]   ;;  %v437_v53 = vsel %vm302_vm5, %v435_v30, %v433_v47  ;;  %v487_v55 = vsel %vm285_vm1, %v485_v50, %v483_v49  ;;  %v585_v62 = vld [vmem:[#allocation1 + $0x51] sm:$0x4]   ;;  %v537_v0 = vsel %vm302_vm5, %v535_v44, %v533_v59  ;;  %v583_v2 = vsel %vm281_vm0, %v581_v61, %v579_v58  ;;  %v594_v3 = vld [vmem:[#allocation1 + $0x36] sm:$0x20]  }
  0x1f   :  { %v502_v57 = vld [vmem:[#allocation1 + $0x65] sm:$0x80]   ;;  %438 = vrot.lane.b32.xlu0 %v437_v53, %s862_s6  ;;  %v492_v60 = vsel %vm290_vm2, %v490_v51, %v487_v55  ;;  %v590_v63 = vld [vmem:[#allocation1 + $0x17b] ss:$-88 sm:%s918_s29]   ;;  %v587_v7 = vsel %vm285_vm1, %v585_v62, %v583_v2  ;;  %v646_v20 = vld [vmem:[#allocation1 + $0x12] sm:$0x1]  }
  0x20   :  { %v496_v1 = vsel %vm294_vm3, %v494_v52, %v492_v60  ;;  %v598_v4 = vld [vmem:[#allocation1 + $0x55] sm:$0x40]   ;;  %v546_v8 = vld [vmem:[#allocation1 + $0x3] sm:$0x1]   ;;  %v592_v12 = vsel %vm290_vm2, %v590_v63, %v587_v7  ;;  %v561_v15 = vld [vmem:[#allocation1 + $0x26] sm:$0x20]  }
  0x21   :  { %v602_v5 = vld [vmem:[#allocation1 + $0x74] sm:$0x80]   ;;  %538 = vrot.lane.b32.xlu1 %v537_v0, %s863_s7  ;;  %v500_v6 = vsel %vm298_vm4, %v498_v56, %v496_v1  ;;  %v548_v9 = vld [vmem:[#allocation1 + $0x22] sm:$0x2]   ;;  %v565_v16 = vld [vmem:[#allocation1 + $0x45] sm:$0x40]   ;;  %v596_v17 = vsel %vm294_vm3, %v594_v3, %v592_v12 }
  0x22   :  { %v552_v10 = vld [vmem:[#allocation1 + $0x41] sm:$0x4]   ;;  %v504_v11 = vsel %vm302_vm5, %v502_v57, %v500_v6  ;;  %v550_v13 = vsel %vm281_vm0, %v548_v9, %v546_v8  ;;  %v569_v19 = vld [vmem:[#allocation1 + $0x64] sm:$0x80]   ;;  %v648_v21 = vld [vmem:[#allocation1 + $0x31] sm:$0x2]   ;;  %v600_v22 = vsel %vm298_vm4, %v598_v4, %v596_v17 }
  0x23   :  { %v557_v14 = vld [vmem:[#allocation1 + $0x16b] ss:$-88 sm:%s920_s30]   ;;  %505 = vrot.lane.b32.xlu0 %v504_v11, %s863_s7  ;;  %v554_v18 = vsel %vm285_vm1, %v552_v10, %v550_v13  ;;  %v650_v24 = vsel %vm281_vm0, %v648_v21, %v646_v20  ;;  %v652_v25 = vld [vmem:[#allocation1 + $0x50] sm:$0x4]   ;;  %v661_v27 = vld [vmem:[#allocation1 + $0x35] sm:$0x20]   ;;  %v604_v28 = vsel %vm302_vm5, %v602_v5, %v600_v22 }
  0x24   :  { %v559_v23 = vsel %vm290_vm2, %v557_v14, %v554_v18  ;;  %v657_v26 = vld [vmem:[#allocation1 + $0x17a] ss:$-88 sm:%s922_s2]   ;;  %v654_v30 = vsel %vm285_vm1, %v652_v25, %v650_v24  ;;  %v713_v47 = vld [vmem:[#allocation1 + $0x11] sm:$0x1]   ;;  %v728_v54 = vld [vmem:[#allocation1 + $0x34] sm:$0x20]  }
  0x25   :  { %v563_v29 = vsel %vm294_vm3, %v561_v15, %v559_v23  ;;  %v665_v31 = vld [vmem:[#allocation1 + $0x54] sm:$0x40]   ;;  %v613_v33 = vld [vmem:[#allocation1 + $0x2] sm:$0x1]   ;;  %605 = vrot.lane.b32.xlu1 %v604_v28, %s864_s8  ;;  %v659_v35 = vsel %vm290_vm2, %v657_v26, %v654_v30  ;;  %v628_v42 = vld [vmem:[#allocation1 + $0x25] sm:$0x20]  }
  0x26   :  { %v669_v32 = vld [vmem:[#allocation1 + $0x73] sm:$0x80]   ;;  %v567_v34 = vsel %vm298_vm4, %v565_v16, %v563_v29  ;;  %v615_v36 = vld [vmem:[#allocation1 + $0x21] sm:$0x2]   ;;  %v663_v40 = vsel %vm294_vm3, %v661_v27, %v659_v35  ;;  %v632_v43 = vld [vmem:[#allocation1 + $0x44] sm:$0x40]  }
  0x27   :  { %v619_v37 = vld [vmem:[#allocation1 + $0x40] sm:$0x4]   ;;  %v571_v39 = vsel %vm302_vm5, %v569_v19, %v567_v34  ;;  %v617_v41 = vsel %vm281_vm0, %v615_v36, %v613_v33  ;;  %v636_v44 = vld [vmem:[#allocation1 + $0x63] sm:$0x80]   ;;  %v667_v45 = vsel %vm298_vm4, %v665_v31, %v663_v40  ;;  %v715_v48 = vld [vmem:[#allocation1 + $0x30] sm:$0x2]  }
  0x28   :  { %v624_v38 = vld [vmem:[#allocation1 + $0x16a] ss:$-88 sm:%s924_s3]   ;;  %572 = vrot.lane.b32.xlu0 %v571_v39, %s864_s8  ;;  %v621_v46 = vsel %vm285_vm1, %v619_v37, %v617_v41  ;;  %v671_v49 = vsel %vm302_vm5, %v669_v32, %v667_v45  ;;  %v717_v51 = vsel %vm281_vm0, %v715_v48, %v713_v47  ;;  %v719_v52 = vld [vmem:[#allocation1 + $0x4f] sm:$0x4]   ;;  %v732_v57 = vld [vmem:[#allocation1 + $0x53] sm:$0x40]  }
  0x29   :  { %v626_v50 = vsel %vm290_vm2, %v624_v38, %v621_v46  ;;  %v724_v53 = vld [vmem:[#allocation1 + $0x179] ss:$-88 sm:%s723_s9]   ;;  %672 = vrot.lane.b32.xlu1 %v671_v49, %s865_s10  ;;  %v721_v56 = vsel %vm285_vm1, %v719_v52, %v717_v51  ;;  %v258_v9 = vld [vmem:[#allocation1] ss:$8 sm:$0xf]   ;;  %v867_v36 = vmov 0.0  }
  0x2a   :  { %v630_v55 = vsel %vm294_vm3, %v628_v42, %v626_v50  ;;  %v736_v58 = vld [vmem:[#allocation1 + $0x72] sm:$0x80]   ;;  %v680_v59 = vld [vmem:[#allocation1 + $0x1] sm:$0x1]   ;;  %v726_v61 = vsel %vm290_vm2, %v724_v53, %v721_v56  ;;  %v695_v4 = vld [vmem:[#allocation1 + $0x24] sm:$0x20]  }
  0x2b   :  { %v634_v60 = vsel %vm298_vm4, %v632_v43, %v630_v55  ;;  %v682_v62 = vld [vmem:[#allocation1 + $0x20] sm:$0x2]   ;;  %v730_v1 = vsel %vm294_vm3, %v728_v54, %v726_v61  ;;  %v699_v5 = vld [vmem:[#allocation1 + $0x43] sm:$0x40]  }
  0x2c   :  { %v686_v63 = vld [vmem:[#allocation1 + $0x3f] sm:$0x4]   ;;  %v638_v0 = vsel %vm302_vm5, %v636_v44, %v634_v60  ;;  %v684_v2 = vsel %vm281_vm0, %v682_v62, %v680_v59  ;;  %v734_v6 = vsel %vm298_vm4, %v732_v57, %v730_v1  ;;  %v703_v8 = vld [vmem:[#allocation1 + $0x62] sm:$0x80]  }
  0x2d   :  { %v691_v3 = vld [vmem:[#allocation1 + $0x169] ss:$-88 sm:%s690_s11]   ;;  %639 = vrot.lane.b32.xlu0 %v638_v0, %s865_s10  ;;  %v688_v7 = vsel %vm285_vm1, %v686_v63, %v684_v2  ;;  %v738_v10 = vsel %vm302_vm5, %v736_v58, %v734_v6  ;;  %v259_v12 = vld [vmem:[#allocation1] ss:$8 sm:$0xf0]  }
  0x2e   :  { %v693_v11 = vsel %vm290_vm2, %v691_v3, %v688_v7  ;;  %v267_v13 = vld [vmem:[#allocation1 + $0x40] ss:$8 sm:$0xf]   ;;  %739 = vrot.lane.b32.xlu1 %v738_v10, %s866_s12  ;;  %v261_v15 = vsel %vm260_vm6, %v259_v12, %v258_v9 }
  0x2f   :  { %v697_v14 = vsel %vm294_vm3, %v695_v4, %v693_v11  ;;  %v269_v16 = vld [vmem:[#allocation1 + $0x40] ss:$8 sm:$0xf0]   ;;  %263 = vst.msk [vmem:[#allocation0] ss:$8 sm:$0xf] %vm262_vm7, %v261_v15  }
  0x30   :  { %v701_v17 = vsel %vm298_vm4, %v699_v5, %v697_v14  ;;  %265 = vst.msk [vmem:[#allocation0 - $0x1f] ss:$8 sm:$0xf0] %vm262_vm7, %v261_v15   ;;  %v271_v18 = vsel %vm260_vm6, %v269_v16, %v267_v13 }
  0x31   :  { %v705_v19 = vsel %vm302_vm5, %v703_v8, %v701_v17  ;;  %274 = vst.msk [vmem:[#allocation0 + $0x2] ss:$8 sm:$0xf] %vm262_vm7, %v271_v18   ;;  %276 = vst.msk [vmem:[#allocation0 - $0x1d] ss:$8 sm:$0xf0] %vm262_vm7, %v271_v18  }
  0x32   :  { %706 = vrot.lane.b32.xlu0 %v705_v19, %s866_s12 }
  0x87   :  { %v372_v20 = vpop.permute.xlu1 %371   ;;  %v305_v21 = vpop.permute.xlu0 %304  }
  0x88   :  { %307 = vst.msk [vmem:[#allocation0] sm:$0xf] %vm306_vm8, %v305_v21   ;;  %309 = vst.msk [vmem:[#allocation0 + $0x4] sm:$0xf0] %vm306_vm8, %v305_v21  }
  0x89   :  { %374 = vst.msk [vmem:[#allocation0] sm:$0xf] %vm373_vm9, %v372_v20   ;;  %376 = vst.msk [vmem:[#allocation0 + $0x4] sm:$0xf0] %vm373_vm9, %v372_v20  }
  0x8b   :  { %v405_v22 = vpop.permute.xlu1 %404   ;;  %v338_v23 = vpop.permute.xlu0 %337  }
  0x8c   :  { %341 = vst.msk [vmem:[#allocation0 + $0x10] sm:$0xf] %vm306_vm8, %v338_v23   ;;  %343 = vst.msk [vmem:[#allocation0 + $0x14] sm:$0xf0] %vm306_vm8, %v338_v23  }
  0x8d   :  { %408 = vst.msk [vmem:[#allocation0 + $0x10] sm:$0xf] %vm373_vm9, %v405_v22   ;;  %410 = vst.msk [vmem:[#allocation0 + $0x14] sm:$0xf0] %vm373_vm9, %v405_v22  }
  0x8f   :  { %v472_v24 = vpop.permute.xlu1 %471  }
  0x90   :  { %475 = vst.msk [vmem:[#allocation0 + $0x10] sm:$0xf] %vm440_vm10, %v472_v24   ;;  %477 = vst.msk [vmem:[#allocation0 + $0x14] sm:$0xf0] %vm440_vm10, %v472_v24  }
  0x91   :  { %v439_v25 = vpop.permute.xlu0 %438  }
  0x92   :  { %441 = vst.msk [vmem:[#allocation0] sm:$0xf] %vm440_vm10, %v439_v25   ;;  %443 = vst.msk [vmem:[#allocation0 + $0x4] sm:$0xf0] %vm440_vm10, %v439_v25  }
  0x93   :  { %v539_v26 = vpop.permute.xlu1 %538  }
  0x94   :  { %542 = vst.msk [vmem:[#allocation0 + $0x10] sm:$0xf] %vm507_vm11, %v539_v26   ;;  %544 = vst.msk [vmem:[#allocation0 + $0x14] sm:$0xf0] %vm507_vm11, %v539_v26  }
  0x95   :  { %v506_v27 = vpop.permute.xlu0 %505  }
  0x96   :  { %508 = vst.msk [vmem:[#allocation0] sm:$0xf] %vm507_vm11, %v506_v27   ;;  %510 = vst.msk [vmem:[#allocation0 + $0x4] sm:$0xf0] %vm507_vm11, %v506_v27  }
  0x97   :  { %v606_v28 = vpop.permute.xlu1 %605  }
  0x98   :  { %609 = vst.msk [vmem:[#allocation0 + $0x10] sm:$0xf] %vm574_vm12, %v606_v28   ;;  %611 = vst.msk [vmem:[#allocation0 + $0x14] sm:$0xf0] %vm574_vm12, %v606_v28  }
  0x9a   :  { %v573_v29 = vpop.permute.xlu0 %572  }
  0x9b   :  { %575 = vst.msk [vmem:[#allocation0] sm:$0xf] %vm574_vm12, %v573_v29   ;;  %577 = vst.msk [vmem:[#allocation0 + $0x4] sm:$0xf0] %vm574_vm12, %v573_v29   ;;  %v673_v30 = vpop.permute.xlu1 %672  }
  0x9c   :  { %676 = vst.msk [vmem:[#allocation0 + $0x10] sm:$0xf] %vm641_vm13, %v673_v30   ;;  %678 = vst.msk [vmem:[#allocation0 + $0x14] sm:$0xf0] %vm641_vm13, %v673_v30  }
  0x9f   :  { %v640_v31 = vpop.permute.xlu0 %639  }
  0xa0   :  { %642 = vst.msk [vmem:[#allocation0] sm:$0xf] %vm641_vm13, %v640_v31   ;;  %644 = vst.msk [vmem:[#allocation0 + $0x4] sm:$0xf0] %vm641_vm13, %v640_v31   ;;  %v740_v32 = vpop.permute.xlu1 %739  }
  0xa1   :  { %743 = vst.msk [vmem:[#allocation0 + $0x10] sm:$0xf] %vm708_vm14, %v740_v32   ;;  %745 = vst.msk [vmem:[#allocation0 + $0x14] sm:$0xf0] %vm708_vm14, %v740_v32  }
  0xa4   :  { %v707_v33 = vpop.permute.xlu0 %706  }
  0xa5   :  { %709 = vst.msk [vmem:[#allocation0] sm:$0xf] %vm708_vm14, %v707_v33   ;;  %711 = vst.msk [vmem:[#allocation0 + $0x4] sm:$0xf0] %vm708_vm14, %v707_v33  }
  0xa8   :  { %v764_v34 = vld [vmem:[#allocation0 + $0x10] sm:$0xf]  ;;  %v772_v35 = vld [vmem:[#allocation0 + $0x18] sm:$0xf] }
  0xa9   :  { %v765_v37 = vpack.c.bf16 %v867_v36, %v764_v34  ;;  %v773_v38 = vpack.c.bf16 %v867_v36, %v772_v35 }
  0xab   :  { %811 = vst [vmem:[%s1043_s1 + $0x4] sm:$0x3] %v765_v37  ;;  %812 = vst [vmem:[%s1043_s1 + $0x6] sm:$0x3] %v773_v38 }
  0xac   :  { %v751_v39 = vld [vmem:[#allocation0] sm:$0xf]  ;;  %v757_v40 = vld [vmem:[#allocation0 + $0x8] sm:$0xf] }
  0xad   :  { %v752_v41 = vpack.c.bf16 %v867_v36, %v751_v39  ;;  %v758_v42 = vpack.c.bf16 %v867_v36, %v757_v40 }
  0xaf   :  { %755 = vst [vmem:[%s1043_s1] sm:$0x3] %v752_v41  ;;  %810 = vst [vmem:[%s1043_s1 + $0x2] sm:$0x3] %v758_v42 }

// kernel: satt_h_gcn.1
= control target key start
LH: loop header
LB: loop body
LE: loop exit
PB: predicated region body
PF: predicated region fallthrough
CT: control target
= control target key end

     0   :  { %7 = vsyncpa [#allocation3], 0  ;;  %s1184_s0 = inlined_call_operand.vmem [shape: bf16[2,16,512], index: 0, kind: input, shape index: {}]   ;;  %s1185_s1 = inlined_call_operand.vmem [shape: bf16[512,8], index: 1, kind: input, shape index: {}]   ;;  %s1186_s2 = inlined_call_operand.hbm [shape: f32[2,16,16], index: 2, kind: output, shape index: {}]  }
   0x1   :  { %9 = vsyncpa [#allocation3 + $0x1], 0  ;;  %s974_s9 = smov 0   ;;  %s976_s10 = smov 0  }
   0x2   :  { %s978_s11 = smov 0   ;;  %s980_s12 = smov 0  }
   0x3 LB: > { %s995_s13 = sadd.s32 4294967295, %s953_s12   ;;  %s696_s14 = sadd.s32 4294967294, %s953_s12   ;;  %s953_s12 = sphi %s980_s12, %s1192_s12   ;;  %s949_s11 = sphi %s978_s11, %s1191_s11   ;;  %s945_s10 = sphi %s976_s10, %s1190_s10   ;;  %s941_s9 = sphi %s974_s9, %s1189_s9  }
   0x4   : > { %s999_s15 = sadd.s32 1, %s953_s12   ;;  %s69_s16 = sadd.s32 1, %s949_s11 }
   0x5   : > { %s66_s17 = ssub.s32 %s953_s12, %s999_s15  ;;  %p79_p0 = scmp.ne.s32.totalorder %s949_s11, %s945_s10 }
   0x6   : > { %p67_p1 = scmp.eq.s32.totalorder %s66_s17, 0  ;;  %p80_p2 = scmp.eq.s32.totalorder %s995_s13, 1 }
   0x7   : > { %p85_p3 = scmp.ne.s32.totalorder %s945_s10, %s941_s9  ;;  %p86_p4 = scmp.eq.s32.totalorder %s696_s14, 1 }
   0x8   : > { %s1010_s18 = scalar_select %p67_p1, %s949_s11, %s69_s16  }
   0x9   : > { %p1012_p5 = por %p80_p2, %p79_p0  ;;  %p1016_p6 = por %p86_p4, %p85_p3 }
   0xa   : > { %p699_p7 = scmp.ge.s32.totalorder %s953_s12, 1  ;;  %p115_p8 = scmp.lt.s32.totalorder %s953_s12, 3 }
   0xc   : > { %p116_p9 = pnand %p699_p7, %p115_p8 }
   0xd   : > { %p137_p10 = scmp.lt.s32.totalorder (!%p116_p9), %s995_s13, 1  ;;  %s955_s5 = smov (!%p116_p9), 124  }
   0xe   : > { %119 = sbr.rel (%p116_p9) target bundleno = 905 (0x389), region = 28  ;;  %s134_s6 = sand.u32 (!%p116_p9), 1, %s945_s10  }
   0xf   : > { %s700_s7 = sshll.u32 (!%p116_p9), %s134_s6, 4  ;;  %s749_s8 = sshll.u32 (!%p116_p9), %s995_s13, 8 }
  0x10   : > { %s136_s14 = scalar_lea.vmem (!%p116_p9), [#allocation2], %s700_s7  ;;  %s1139_s22 = scalar_lea.hbm (!%p116_p9), %s1186_s2, %s749_s8 }
  0x11   : > { %s1144_s23 = scalar_lea.sflag (!%p116_p9), [#allocation3], %s134_s6  ;;  %s956_s24 = smov (!%p116_p9), [#allocation2]  }
  0x12   : > { %s897_s25 = sshll.u32 (!%p116_p9), %s956_s24, 4  ;;  %s898_s25 = int_to_ptr.vmem [resolvable:$false] %s897_s25 }
  0x13   : > { %v847_v0 = vld [vmem:[%s1185_s1 + $0x78] sm:$0xff]   ;;  %v851_v4 = vld [vmem:[%s1185_s1 + $0x70] sm:$0xff]   ;;  %v855_v8 = vld [vmem:[%s1185_s1 + $0x68] sm:$0xff]   ;;  %s138_s29 = scalar_select %p137_p10, %s995_s13, 1  ;;  %vm511_vm0 = vcmask 31744   ;;  %vm595_vm1 = vcmask 130048  }
  0x14   : > { %v848_v1 = vld [vmem:[%s1185_s1 + $0xf8] sm:$0xff]   ;;  %750 = vmatprep.subr.bf16.mxu0 %v847_v0  ;;  %v852_v5 = vld [vmem:[%s1185_s1 + $0xf0] sm:$0xff]   ;;  %v856_v9 = vld [vmem:[%s1185_s1 + $0xe8] sm:$0xff]   ;;  %s899_s26 = scalar_lea.vmem %s898_s25, 512 }
  0x15   : > { %v849_v2 = vld [vmem:[%s1185_s1 + $0x38] sm:$0xff]   ;;  %772 = vmatprep.subr.bf16.mxu1 %v848_v1  ;;  %v853_v6 = vld [vmem:[%s1185_s1 + $0x30] sm:$0xff]   ;;  %v857_v10 = vld [vmem:[%s1185_s1 + $0x28] sm:$0xff]   ;;  %s748_s16 = sshll.u32 %s138_s29, 5 }
  0x16   : > { %v850_v3 = vld [vmem:[%s1185_s1 + $0xb8] sm:$0xff]   ;;  %751 = vmatpush3.bf16.msra.mxu0 %v849_v2  ;;  %v854_v7 = vld [vmem:[%s1185_s1 + $0xb0] sm:$0xff]   ;;  %v858_v11 = vld [vmem:[%s1185_s1 + $0xa8] sm:$0xff]   ;;  %s141_s28 = scalar_lea.vmem %s1184_s0, %s748_s16  ;;  %s634_s16 = sshll.u32 %s136_s14, 4  ;;  %s1141_s16 = int_to_ptr.vmem [resolvable:$true] %s634_s16 }
  0x17   : > { %773 = vmatpush3.bf16.msra.mxu1 %v850_v3  ;;  %752 = vmatprep.subr.bf16.mxu0 %v851_v4  ;;  %v859_v12 = vld [vmem:[%s1185_s1 + $0x60] sm:$0xff]   ;;  %v863_v16 = vld [vmem:[%s1185_s1 + $0x58] sm:$0xff]   ;;  %v867_v20 = vld [vmem:[%s1185_s1 + $0x50] sm:$0xff]   ;;  %s893_s13 = scalar_lea.vmem %s1141_s16, 256  ;;  %p900_p0 = scmp.lt.s32.totalorder %s1141_s16, %s898_s25 }
  0x18   : > { %774 = vmatprep.subr.bf16.mxu1 %v852_v5  ;;  %v860_v13 = vld [vmem:[%s1185_s1 + $0xe0] sm:$0xff]   ;;  %v864_v17 = vld [vmem:[%s1185_s1 + $0xd8] sm:$0xff]   ;;  %v868_v21 = vld [vmem:[%s1185_s1 + $0xd0] sm:$0xff]   ;;  %p894_p11 = scmp.ne.s32.totalorder %s1141_s16, %s893_s13  ;;  %p901_p1 = scmp.lt.s32.totalorder %s899_s26, %s893_s13 }
  0x19   : > { %v861_v14 = vld [vmem:[%s1185_s1 + $0x20] sm:$0xff]   ;;  %v865_v18 = vld [vmem:[%s1185_s1 + $0x18] sm:$0xff]   ;;  %v869_v22 = vld [vmem:[%s1185_s1 + $0x10] sm:$0xff]  }
  0x1a   : > { %753 = vmatpush3.bf16.msra.mxu0 %v853_v6  ;;  %v862_v15 = vld [vmem:[%s1185_s1 + $0xa0] sm:$0xff]   ;;  %v866_v19 = vld [vmem:[%s1185_s1 + $0x98] sm:$0xff]   ;;  %v870_v23 = vld [vmem:[%s1185_s1 + $0x90] sm:$0xff]   ;;  %p895_p12 = pnand %p894_p11, %p1012_p5  ;;  %p902_p2 = por %p901_p1, %p900_p0 }
  0x1b   : > { %775 = vmatpush3.bf16.msra.mxu1 %v854_v7  ;;  %754 = vmatprep.subr.bf16.mxu0 %v855_v8  ;;  %v871_v24 = vld [vmem:[%s1185_s1 + $0x48] sm:$0xff]   ;;  %v875_v28 = vld [vmem:[%s1185_s1 + $0x40] sm:$0xff]  }
  0x1c   : > { %776 = vmatprep.subr.bf16.mxu1 %v856_v9  ;;  %v872_v25 = vld [vmem:[%s1185_s1 + $0xc8] sm:$0xff]   ;;  %v876_v29 = vld [vmem:[%s1185_s1 + $0xc0] sm:$0xff]   ;;  %p896_p13 = pneg %p895_p12 }
  0x1d   : > { %v873_v26 = vld [vmem:[%s1185_s1 + $0x8] sm:$0xff]   ;;  %v877_v30 = vld [vmem:[%s1185_s1] sm:$0xff]  }
  0x1e   : > { %755 = vmatpush3.bf16.msra.mxu0 %v857_v10  ;;  %v874_v27 = vld [vmem:[%s1185_s1 + $0x88] sm:$0xff]   ;;  %v878_v31 = vld [vmem:[%s1185_s1 + $0x80] sm:$0xff]   ;;  %p903_p3 = pnand %p902_p2, %p896_p13 }
  0x1f   : > { %777 = vmatpush3.bf16.msra.mxu1 %v858_v11  ;;  %756 = vmatprep.subr.bf16.mxu0 %v859_v12  ;;  %v879_v32 = vld [vmem:[%s141_s28] ss:$16 sps:$4 sm:$0xff]   ;;  %v881_v33 = vld [vmem:[%s141_s28 + $0x4] ss:$16 sps:$4 sm:$0xff]   ;;  %v882_v34 = vld [vmem:[%s141_s28 + $0x8] ss:$16 sps:$4 sm:$0xff]  }
  0x20   : > { %778 = vmatprep.subr.bf16.mxu1 %v860_v13  ;;  %v884_v35 = vld [vmem:[%s141_s28 + $0xc] ss:$16 sps:$4 sm:$0xff]   ;;  %455 = vmatprep.mubr.bf16.mxu0 %v881_v33 }
  0x21   : > { %496 = vmatprep.mubr.bf16.mxu1 %v884_v35 }
  0x22   : > { %757 = vmatpush3.bf16.msra.mxu0 %v861_v14 }
  0x23   : > { %779 = vmatpush3.bf16.msra.mxu1 %v862_v15  ;;  %758 = vmatprep.subr.bf16.mxu0 %v863_v16 }
  0x24   : > { %780 = vmatprep.subr.bf16.mxu1 %v864_v17 }
  0x26   : > { %759 = vmatpush3.bf16.msra.mxu0 %v865_v18 }
  0x27   : > { %781 = vmatpush3.bf16.msra.mxu1 %v866_v19  ;;  %760 = vmatprep.subr.bf16.mxu0 %v867_v20 }
  0x28   : > { %782 = vmatprep.subr.bf16.mxu1 %v868_v21 }
  0x2a   : > { %761 = vmatpush3.bf16.msra.mxu0 %v869_v22 }
  0x2b   : > { %783 = vmatpush3.bf16.msra.mxu1 %v870_v23  ;;  %762 = vmatprep.subr.bf16.mxu0 %v871_v24 }
  0x2c   : > { %784 = vmatprep.subr.bf16.mxu1 %v872_v25 }
  0x2e   : > { %763 = vmatpush3.bf16.msra.mxu0 %v873_v26 }
  0x2f   : > { %785 = vmatpush3.bf16.msra.mxu1 %v874_v27  ;;  %764 = vmatprep.subr.bf16.mxu0 %v875_v28 }
  0x30   : > { %786 = vmatprep.subr.bf16.mxu1 %v876_v29 }
  0x32   : > { %765 = vmatpush3.bf16.msra.mxu0 %v877_v30 }
  0x33   : > { %787 = vmatpush3.bf16.msra.mxu1 %v878_v31 }
  0x35   : > { %456 = vmatmul.mubr.bf16.vlgmr.msra.gmra.mxu0 %v879_v32 }
  0x36   : > { %497 = vmatmul.mubr.bf16.vlgmr.msra.gmra.mxu1 %v882_v34 }
  0xf5   : > { %v766_v36 = vpop.f32.mrf.mxu0 }
  0xf6   : > { %v788_v37 = vpop.f32.mrf.mxu1 }
  0xf7   : > { %v767_v38 = vpop.f32.mrf.mxu0 }
  0xf8   : > { %v768_v39 = vadd.f32 %v767_v38, %v766_v36  ;;  %v789_v40 = vpop.f32.mrf.mxu1 }
  0xf9   : > { %v790_v41 = vadd.f32 %v789_v40, %v788_v37  ;;  %v769_v42 = vpop.f32.mrf.mxu0 }
  0xfa   : > { %v791_v43 = vpop.f32.mrf.mxu1 }
  0xfb   : > { %v499_v44 = vadd.f32 %v790_v41, %v768_v39  ;;  %v770_v45 = vpop.f32.mrf.mxu0 }
  0xfc   : > { %v771_v46 = vadd.f32 %v770_v45, %v769_v42  ;;  %v792_v47 = vpop.f32.mrf.mxu1 }
  0xfd   : > { %v793_v48 = vadd.f32 %v792_v47, %v791_v43  ;;  %802 = vmatprep.mubr.msk.f32.mxu0 %vm511_vm0, %v499_v44 }
  0xff   : > { %v502_v49 = vadd.f32 %v793_v48, %v771_v46 }
 0x101   : > { %509 = vrot.lane.b32.xlu0 %v502_v49, %s955_s5 }
 0x105   : > { %507 = vrot.lane.b32.xlu0 %v499_v44, %s955_s5 }
 0x173   : > { %v510_v50 = vpop.permute.xlu0 %509 }
 0x174   : > { %798 = vmatprep.subr.msk.mxu0 %vm511_vm0, %v510_v50 }
 0x175   : > { %799 = vmatpush3.xpose.msk.msra.mxu0 %vm511_vm0, %v510_v50 }
 0x177   : > { %v508_v51 = vpop.permute.xlu0 %507 }
 0x178   : > { %800 = vmatprep.subr.msk.mxu0 %vm511_vm0, %v508_v51 }
 0x179   : > { %801 = vmatpush3.xpose.msk.msra.mxu0 %vm511_vm0, %v508_v51 }
 0x17c   : > { %803 = vmatmul.mubr.msk.f32.vlgmr.msra.gmra.mxu0 %vm511_vm0, %v502_v49 }
 0x23c   : > { %v804_v52 = vpop.f32.mrf.mxu0 }
 0x23d   : > { %v599_v55 = vsel %vm595_vm1, %v804_v52, -inf }
 0x23e   : > { %v586_v53 = vpop.f32.mrf.mxu0 }
 0x23f   : > { %v596_v54 = vsel %vm595_vm1, %v586_v53, -inf }
 0x240   : > { %597 = vmax.xlane.f32.xlu1 %v596_v54 }
 0x244   : > { %600 = vmax.xlane.f32.xlu1 %v599_v55 }
 0x2c9   : > { %v598_v56 = vpop.xlane.xlu1 %597 }
 0x2ca   : > { %v602_v57 = vsub.f32 %v586_v53, %v598_v56 }
 0x2cc   : > { %v604_v58 = vmul.f32 1.442695, %v602_v57 }
 0x2cd   : > { %v601_v59 = vpop.xlane.xlu1 %600 }
 0x2ce   : > { %885 = vpow2.f32 %v604_v58  ;;  %v603_v60 = vsub.f32 %v804_v52, %v601_v59 }
 0x2d0   : > { %v606_v61 = vmul.f32 1.442695, %v603_v60 }
 0x2d2   : > { %887 = vpow2.f32 %v606_v61 }
 0x2db   : > { %v886_v62 = vpop.eup %885 }
 0x2dc   : > { %v608_v63 = vsel %vm595_vm1, %v886_v62, 0.0 }
 0x2dd   : > { %609 = vadd.xlane.f32.xlu0 %v608_v63 }
 0x2df   : > { %v888_v0 = vpop.eup %887 }
 0x2e0   : > { %v611_v1 = vsel %vm595_vm1, %v888_v0, 0.0 }
 0x2e1   : > { %612 = vadd.xlane.f32.xlu1 %v611_v1 }
 0x366   : > { %v610_v2 = vpop.xlane.xlu0 %609 }
 0x367   : > { %889 = vrcp.f32 %v610_v2 }
 0x36a   : > { %v613_v3 = vpop.xlane.xlu1 %612 }
 0x36b   : > { %891 = vrcp.f32 %v613_v3 }
 0x374   : > { %v890_v4 = vpop.eup %889 }
 0x375   : > { %v616_v5 = vmul.f32 %v890_v4, %v886_v62 }
 0x377   : > { %618 = vst.msk [vmem:[%s136_s14] sm:$0xff] %vm595_vm1, %v616_v5 }
 0x378   : > { %v892_v6 = vpop.eup %891 }
 0x379   : > { %v617_v7 = vmul.f32 %v892_v6, %v888_v0 }
 0x37b   : > { %619 = vst.msk [vmem:[%s136_s14 + $0x8] sm:$0xff] %vm595_vm1, %v617_v7 }
 0x37c   : > { %906 = shalt.err (!%p903_p3)
}
 0x37d   : > { %s907_s27 = scalar_lea.hbm %s1139_s22, 256  ;;  %s911_s30 = scalar_lea.hbm %s1186_s2, 512 }
 0x37e   : > { %p908_p4 = scmp.ne.s32.totalorder %s1139_s22, %s907_s27  ;;  %p912_p9 = scmp.lt.s32.totalorder %s1139_s22, %s1186_s2 }
 0x37f   : > { %p913_p10 = scmp.lt.s32.totalorder %s911_s30, %s907_s27 }
 0x380   : > { %p909_p7 = pnand %p908_p4, %p1012_p5 }
 0x381   : > { %p914_p11 = por %p913_p10, %p912_p9 }
 0x382   : > { %p910_p8 = pneg %p909_p7 }
 0x384   : > { %p915_p12 = pnand %p914_p11, %p910_p8 }
 0x386   : > { %918 = shalt.err (!%p915_p12)
}
 0x387   : > { %s957_s5 = smov 128   ;;  %s958_s6 = smov 8  }
 0x388   : > { %805 = dma.vmem_to_hbm [thread:$0]  (%p1012_p5), %s1141_s16, 256, %s1139_s22, %s1144_s23, %s957_s5, %s957_s5, %s958_s6  }
 0x389 PF: > { %p811_p13 = scmp.ge.s32.totalorder %s953_s12, 2  ;;  %s649_s7 = sand.u32 1, %s941_s9  }
 0x38a   : > { %s650_s8 = scalar_lea.sflag [#allocation3], %s649_s7 }
 0x38b   : > { %p808_p0 = pnand %p811_p13, %p1016_p6 }
 0x38d   : > { %p809_p1 = pneg %p808_p0 }
 0x38f   : > { %936 = dma.done.wait (%p809_p1), %s650_s8, 256  }
 0x390   : > { %938 = vsyncadd (%p809_p1), %s650_s8, 4294967040  ;;  %p12_p2 = scmp.ge.s32.totalorder %s999_s15, 4   ;;  %s1189_s9 = smov %s945_s10 }
 0x391   : > { %s1190_s10 = smov %s949_s11  ;;  %s1191_s11 = smov %s1010_s18 }
 0x392   : > { %s1192_s12 = smov %s999_s15  ;;  %14 = sbr.rel (!%p12_p2) target bundleno = 3 (0x3), region = 63 }
 0x397   :  { %655 = vsyncpa [#allocation3], 1 }
 0x398   :  { %657 = vsyncpa [#allocation3 + $0x1], 1 }

</bundles_post_ra>
